<compile_context>
chip_gen: v5e
topology: v5e:2x2
jax: 0.10.0
libtpu: 0.0.40
codegen_flags: <defaults>
</compile_context>

<pallas_src>
import jax
import jax.numpy as jnp
from jax.experimental import pallas as pl
from jax.experimental.pallas import tpu as pltpu

W_LANES = 128            # samples per output lane-row (output lane width)
C_LANES = 2 * W_LANES    # interleaved (x0, x1) lanes per input row = 256
_TR_MAX = 4096           # rows per grid step cap (~12.3 MiB double-buffered VMEM)
_TARGET_STEPS = 8        # aim for >= 8 grid steps so both v7x TCs get work


def _round_up(x: int, m: int) -> int:
    return ((x + m - 1) // m) * m


def _pick_tr(m_rows: int) -> int:
    """Rows per grid step: multiple of 8 (sublane), VMEM-capped, or the full dim."""
    tr = _round_up(-(-m_rows // _TARGET_STEPS), 8)
    tr = max(8, min(_TR_MAX, tr))
    return m_rows if tr > m_rows else tr


def linear_kernel(b_ref, p_ref, x_ref, o_ref):
    # b_ref: SMEM (1,) f32 bias (scalar read).
    # p_ref: VMEM (256, 128) block-diagonal weight fold, resident across steps.
    # x_ref: VMEM (tr, 256) lane-interleaved [x0, x1, x0, x1, ...] samples.
    # o_ref: VMEM (tr, 128) outputs (one sample per lane), fully lane/sublane dense.
    o_ref[...] = (
        jnp.dot(x_ref[...], p_ref[...],
                preferred_element_type=jnp.float32,
                precision=jax.lax.Precision.HIGHEST)   # keep full f32 semantics
        + b_ref[0]
    )


def _jnp_linear(x, weight, bias):
    # Exact-f32 elementwise path for tiny batches / ragged tails (no skinny matmul).
    return x[:, 0:1] * weight[0, 0] + x[:, 1:2] * weight[0, 1] + bias[0]


def _linear_main(x_aligned, weight, bias):
    """Pallas path for the 128-sample-aligned prefix. x_aligned: (M*128, 2) f32."""
    n = x_aligned.shape[0]
    m_rows = n // W_LANES
    # Free row-major reshape (no HBM relayout): (n, 2) -> (m_rows, 256).
    x2 = x_aligned.reshape(m_rows, C_LANES)
    # Fold the (1, 2) weight into P (256, 128): P[2j, j] = w0, P[2j+1, j] = w1.
    # x2 @ P computes w0*x0 + w1*x1 per lane pair AND compacts 256 -> 128 lanes
    # in a single MXU op (no XLU shuffles, no strided / lane-sparse access).
    p = jnp.kron(jnp.eye(W_LANES, dtype=x_aligned.dtype), weight.reshape(2, 1))

    tr = _pick_tr(m_rows)
    grid = (pl.cdiv(m_rows, tr),)   # partial trailing row-block is masked by Pallas

    out = pl.pallas_call(
        linear_kernel,
        out_shape=jax.ShapeDtypeStruct((m_rows, W_LANES), x_aligned.dtype),
        grid=grid,
        in_specs=[
            pl.BlockSpec(memory_space=pltpu.MemorySpace.SMEM),     # bias scalar
            pl.BlockSpec((C_LANES, W_LANES), lambda i: (0, 0)),    # P, resident
            pl.BlockSpec((tr, C_LANES), lambda i: (i, 0)),         # X row-block
        ],
        out_specs=pl.BlockSpec((tr, W_LANES), lambda i: (i, 0)),
        compiler_params=pltpu.CompilerParams(
            dimension_semantics=("parallel",),   # shard rows across v7x's 2 TCs
        ),
    )(bias, p, x2)

    # (m_rows, 128) row-major == (n, 1) row-major: free reshape, no transpose.
    return out.reshape(n, 1)


@jax.jit
def linear_forward(x, weight, bias):
    """x: (N, 2) f32, weight: (1, 2) f32, bias: (1,) f32 -> (N, 1) f32."""
    n, f = x.shape
    assert f == 2 and weight.shape == (1, f) and bias.shape == (1,)

    n_main = (n // W_LANES) * W_LANES
    if n_main == 0:
        # Tiny batch: pallas_call fixed overhead dominates -- plain jnp.
        return _jnp_linear(x, weight, bias)

    x_main = x if n_main == n else x[:n_main]
    y_main = _linear_main(x_main, weight, bias)
    if n_main == n:
        return y_main
    # Ragged tail (< 128 samples): trivial jnp epilogue, fused by XLA.
    y_tail = _jnp_linear(x[n_main:], weight, bias)
    return jnp.concatenate([y_main, y_tail], axis=0)


if __name__ == "__main__":
    key = jax.random.PRNGKey(0)
    kx, kw, kb = jax.random.split(key, 3)

    F_IN, F_OUT = 2, 1
    # Deterministic init mimicking nn.Linear's uniform(-1/sqrt(fan_in), 1/sqrt(fan_in)).
    bound = 1.0 / jnp.sqrt(jnp.float32(F_IN))
    weight = jax.random.uniform(kw, (F_OUT, F_IN), dtype=jnp.float32,
                                minval=-bound, maxval=bound)
    bias = jax.random.uniform(kb, (F_OUT,), dtype=jnp.float32,
                              minval=-bound, maxval=bound)

    def _check(x):
        y = linear_forward(x, weight, bias)
        jax.block_until_ready(y)
        ref = jnp.dot(x, weight.T, precision=jax.lax.Precision.HIGHEST) + bias
        assert y.shape == (x.shape[0], F_OUT)
        assert jnp.allclose(y, ref, atol=1e-5, rtol=1e-5)

    # 1) Lane-aligned small batch (N % 128 == 0): single-step Pallas path.
    _check(jax.random.normal(kx, (512, F_IN), dtype=jnp.float32))
    # 2) Ragged batch: Pallas on the 256-sample prefix + exact jnp tail of 44.
    _check(jax.random.normal(jax.random.PRNGKey(1), (300, F_IN), dtype=jnp.float32))
    # 3) Multi-step grid (M=41 rows, tr=8) with a masked partial trailing block.
    _check(jax.random.normal(jax.random.PRNGKey(2), (128 * 41, F_IN), dtype=jnp.float32))

    print("KERNEL_OK")
</pallas_src>

<mosaic_0001>
module attributes {stable_mosaic.version = 11 : i64} {
  func.func @linear_kernel(%arg0: i32, %arg1: memref<1xf32, #tpu.memory_space<smem>>, %arg2: memref<256x128xf32, #tpu.memory_space<vmem>>, %arg3: memref<4x256xf32, #tpu.memory_space<vmem>>, %arg4: memref<4x128xf32, #tpu.memory_space<vmem>>) attributes {dimension_semantics = [#tpu.dimension_semantics<parallel>], iteration_bounds = array<i64: 1>, scalar_prefetch = 0 : i64, scratch_operands = 0 : i64, tpu.core_type = #tpu.core_type<tc>, window_params = [{transform_indices = @transform_0, window_bounds = array<i64: 1>}, {pipeline_mode = #tpu.pipeline_mode<synchronous>, transform_indices = @transform_1, window_bounds = array<i64: 256, 128>}, {transform_indices = @transform_2, window_bounds = array<i64: 4, 256>}, {transform_indices = @transform_3, window_bounds = array<i64: 4, 128>}]} {
    %c0 = arith.constant 0 : index
    %c0_0 = arith.constant 0 : index
    %0 = vector.load %arg3[%c0, %c0_0] : memref<4x256xf32, #tpu.memory_space<vmem>>, vector<4x256xf32>
    %c0_1 = arith.constant 0 : index
    %c0_2 = arith.constant 0 : index
    %1 = vector.load %arg2[%c0_1, %c0_2] : memref<256x128xf32, #tpu.memory_space<vmem>>, vector<256x128xf32>
    %cst = arith.constant dense<0.000000e+00> : vector<4x128xf32>
    %2 = tpu.matmul %0, %1, %cst {dimension_numbers = #tpu.dot_dimension_numbers<[1], [0], [0], [1], [0, 0, 1, 1], [], []>, precision = #tpu.contract_precision<fp32>} : vector<4x256xf32>, vector<256x128xf32>, vector<4x128xf32> -> vector<4x128xf32>
    %c0_3 = arith.constant 0 : index
    %3 = memref.load %arg1[%c0_3] : memref<1xf32, #tpu.memory_space<smem>>
    %4 = vector.broadcast %3 : f32 to vector<4x128xf32>
    %5 = arith.addf %2, %4 : vector<4x128xf32>
    %c0_4 = arith.constant 0 : index
    %c0_5 = arith.constant 0 : index
    %6 = vector.load %arg4[%c0_4, %c0_5] : memref<4x128xf32, #tpu.memory_space<vmem>>, vector<4x128xf32>
    tpu.vector_store %arg4[%c0_4, %c0_5], %5 {strides = array<i32>} : memref<4x128xf32, #tpu.memory_space<vmem>>, vector<4x128xf32>,
    return
  }
  func.func @transform_0(%arg0: i32) -> i32 {
    %c0_i32 = arith.constant 0 : i32
    %c0_i32_0 = arith.constant 0 : i32
    return %c0_i32 : i32
  }
  func.func @transform_1(%arg0: i32) -> (i32, i32) {
    %c0_i32 = arith.constant 0 : i32
    %c0_i32_0 = arith.constant 0 : i32
    %c0_i32_1 = arith.constant 0 : i32
    return %c0_i32, %c0_i32_0 : i32, i32
  }
  func.func @transform_2(%arg0: i32) -> (i32, i32) {
    %c0_i32 = arith.constant 0 : i32
    %c0_i32_0 = arith.constant 0 : i32
    return %arg0, %c0_i32 : i32, i32
  }
  func.func @transform_3(%arg0: i32) -> (i32, i32) {
    %c0_i32 = arith.constant 0 : i32
    %c0_i32_0 = arith.constant 0 : i32
    return %arg0, %c0_i32 : i32, i32
  }
}

</mosaic_0001>

<bundles_post_ra>
// kernel: linear_forward.1
= control target key start
LH: loop header
LB: loop body
LE: loop exit
PB: predicated region body
PF: predicated region fallthrough
CT: control target
= control target key end

     0   :  { %s1415_s0 = inlined_call_operand.<no memory space> [shape: f32[1], index: 0, kind: input, shape index: {}]   ;;  %s1416_s1 = inlined_call_operand.vmem [shape: f32[256,128], index: 1, kind: input, shape index: {}]   ;;  %s1417_s2 = inlined_call_operand.vmem [shape: f32[4,256], index: 2, kind: input, shape index: {}]   ;;  %s1418_s3 = inlined_call_operand.hbm [shape: f32[4,128], index: 3, kind: output, shape index: {}]  }
   0x1   :  { %v32_v0 = vld [vmem:[%s1416_s1 + $0x78] sm:$0xff]  ;;  %v31_v1 = vld [vmem:[%s1416_s1 + $0x70] sm:$0xff]  ;;  %v30_v2 = vld [vmem:[%s1416_s1 + $0x68] sm:$0xff] }
   0x2   :  { %v813_v3 = vand.u32 4294901760, %v32_v0  ;;  %v815_v4 = vand.u32 4294901760, %v31_v1  ;;  %v817_v5 = vand.u32 4294901760, %v30_v2  ;;  %v29_v6 = vld [vmem:[%s1416_s1 + $0x60] sm:$0xff]  ;;  %v28_v7 = vld [vmem:[%s1416_s1 + $0x58] sm:$0xff]  ;;  %v27_v8 = vld [vmem:[%s1416_s1 + $0x50] sm:$0xff] }
   0x3   :  { %v828_v9 = vand.u32 4294901760, %v29_v6  ;;  %v830_v10 = vand.u32 4294901760, %v28_v7  ;;  %v832_v11 = vand.u32 4294901760, %v27_v8  ;;  %v26_v12 = vld [vmem:[%s1416_s1 + $0x48] sm:$0xff]  ;;  %v25_v13 = vld [vmem:[%s1416_s1 + $0x40] sm:$0xff]  ;;  %v24_v21 = vld [vmem:[%s1416_s1 + $0x38] sm:$0xff] }
   0x4   :  { %58 = vmatpush.msra.mxu0 %v813_v3  ;;  %v842_v14 = vsub.f32 %v32_v0, %v813_v3  ;;  %v845_v15 = vsub.f32 %v31_v1, %v815_v4  ;;  %254 = vmatpush.msra.mxu3 %v813_v3  ;;  %v849_v16 = vsub.f32 %v30_v2, %v817_v5  ;;  %v851_v17 = vand.u32 4294901760, %v26_v12  ;;  %v23_v26 = vld [vmem:[%s1416_s1 + $0x30] sm:$0xff] }
   0x5   :  { %v854_v18 = vsub.f32 %v29_v6, %v828_v9  ;;  %v857_v19 = vsub.f32 %v28_v7, %v830_v10  ;;  %v860_v20 = vsub.f32 %v27_v8, %v832_v11  ;;  %v870_v25 = vand.u32 4294901760, %v25_v13 }
   0x6   :  { %60 = vmatpush.msra.mxu0 %v815_v4  ;;  %201 = vmatpush.msra.mxu2 %v842_v14  ;;  %v100_v22 = vand.u32 4294901760, %v842_v14  ;;  %v1434_v23 = vand.u32 4294901760, %v845_v15  ;;  %v1432_v24 = vand.u32 4294901760, %v849_v16  ;;  %v879_v29 = vsub.f32 %v26_v12, %v851_v17 }
   0x7   :  { %256 = vmatpush.msra.mxu3 %v815_v4  ;;  %v1431_v27 = vand.u32 4294901760, %v854_v18  ;;  %v1428_v28 = vand.u32 4294901760, %v857_v19  ;;  %v892_v33 = vand.u32 4294901760, %v24_v21 }
   0x8   :  { %62 = vmatpush.msra.mxu0 %v817_v5  ;;  %204 = vmatpush.msra.mxu2 %v845_v15  ;;  %v101_v30 = vsub.f32 %v842_v14, %v100_v22  ;;  %v107_v31 = vsub.f32 %v845_v15, %v1434_v23  ;;  %v113_v32 = vsub.f32 %v849_v16, %v1432_v24 }
   0x9   :  { %9 = vsyncpa [#allocation4], 0  ;;  %258 = vmatpush.msra.mxu3 %v817_v5  ;;  %v895_v34 = vand.u32 4294901760, %v23_v26  ;;  %v1426_v35 = vand.u32 4294901760, %v860_v20  ;;  %v22_v36 = vld [vmem:[%s1416_s1 + $0x28] sm:$0xff]  ;;  %v119_v39 = vsub.f32 %v854_v18, %v1431_v27  ;;  %v907_v40 = vsub.f32 %v25_v13, %v870_v25  ;;  %v21_v42 = vld [vmem:[%s1416_s1 + $0x20] sm:$0xff] }
   0xa   :  { %64 = vmatpush.msra.mxu0 %v828_v9  ;;  %v102_v37 = vand.u32 4294901760, %v101_v30  ;;  %207 = vmatpush.msra.mxu2 %v849_v16  ;;  %v108_v38 = vand.u32 4294901760, %v107_v31  ;;  %v125_v41 = vsub.f32 %v857_v19, %v1428_v28  ;;  %v114_v43 = vand.u32 4294901760, %v113_v32  ;;  %v20_v47 = vld [vmem:[%s1416_s1 + $0x18] sm:$0xff]  ;;  %v19_v54 = vld [vmem:[%s1416_s1 + $0x10] sm:$0xff]  ;;  %v16_v55 = vld [vmem:[%s1417_s2] sm:$0xff] }
   0xb   :  { %260 = vmatpush.msra.mxu3 %v828_v9  ;;  %v917_v44 = vand.u32 4294901760, %v22_v36  ;;  %v1425_v45 = vand.u32 4294901760, %v879_v29  ;;  %v921_v46 = vsub.f32 %v24_v21, %v892_v33  ;;  %v131_v48 = vsub.f32 %v860_v20, %v1426_v35  ;;  %v48_v60 = vld [vmem:[%s1416_s1 + $0xf8] sm:$0xff]  ;;  %52 = vst [vmem:[#allocation1] ss:$2 sm:$0xff] %v16_v55  ;;  %v18_v62 = vld [vmem:[%s1416_s1 + $0x8] sm:$0xff] }
   0xc   :  { %66 = vmatpush.msra.mxu0 %v830_v10  ;;  %103 = vmatpush.msra.mxu1 %v102_v37  ;;  %v120_v49 = vand.u32 4294901760, %v119_v39  ;;  %v932_v50 = vand.u32 4294901760, %v21_v42  ;;  %v1424_v51 = vand.u32 4294901760, %v907_v40  ;;  %v936_v52 = vsub.f32 %v23_v26, %v895_v34  ;;  %v17_v6 = vld [vmem:[%s1416_s1] sm:$0xff]  ;;  %v47_v7 = vld [vmem:[%s1416_s1 + $0xf0] sm:$0xff]  ;;  %s747_s26 = sshll.u32 %s1418_s3, 4  ;;  %s748_s26 = int_to_ptr.hbm [resolvable:$true] %s747_s26 }
   0xd   :  { %210 = vmatpush.msra.mxu2 %v854_v18  ;;  %262 = vmatpush.msra.mxu3 %v830_v10  ;;  %v940_v53 = vand.u32 4294901760, %v20_v47  ;;  %v126_v56 = vand.u32 4294901760, %v125_v41  ;;  %v137_v57 = vsub.f32 %v879_v29, %v1425_v45  ;;  %v1423_v58 = vand.u32 4294901760, %v921_v46  ;;  %v41_v45 = vld [vmem:[%s1416_s1 + $0xc0] sm:$0xff] }
   0xe   :  { %68 = vmatpush.msra.mxu0 %v832_v11  ;;  %109 = vmatpush.msra.mxu1 %v108_v38  ;;  %v954_v59 = vsub.f32 %v22_v36, %v917_v44  ;;  %v132_v61 = vand.u32 4294901760, %v131_v48  ;;  %v143_v63 = vsub.f32 %v907_v40, %v1424_v51  ;;  %v968_v0 = vand.u32 4294901760, %v19_v54  ;;  %v46_v36 = vld [vmem:[%s1416_s1 + $0xe8] sm:$0xff] }
   0xf   :  { %213 = vmatpush.msra.mxu2 %v857_v19  ;;  %264 = vmatpush.msra.mxu3 %v832_v11  ;;  %v1422_v1 = vand.u32 4294901760, %v936_v52  ;;  %v972_v2 = vsub.f32 %v21_v42, %v932_v50  ;;  %v983_v8 = vsub.f32 %v20_v47, %v940_v53  ;;  %v985_v12 = vand.u32 4294901760, %v48_v60  ;;  %v45_v47 = vld [vmem:[%s1416_s1 + $0xe0] sm:$0xff] }
  0x10   :  { %70 = vmatpush.msra.mxu0 %v851_v17  ;;  %115 = vmatpush.msra.mxu1 %v114_v43  ;;  %v138_v13 = vand.u32 4294901760, %v137_v57  ;;  %v149_v21 = vsub.f32 %v921_v46, %v1423_v58  ;;  %v991_v26 = vand.u32 4294901760, %v18_v62  ;;  %v1420_v30 = vand.u32 4294901760, %v954_v59 }
  0x11   :  { %216 = vmatpush.msra.mxu2 %v860_v20  ;;  %266 = vmatpush.msra.mxu3 %v851_v17  ;;  %v996_v31 = vand.u32 4294901760, %v17_v6  ;;  %v998_v32 = vand.u32 4294901760, %v47_v7  ;;  %v144_v37 = vand.u32 4294901760, %v143_v63  ;;  %v155_v38 = vsub.f32 %v936_v52, %v1422_v1 }
  0x12   :  { %72 = vmatpush.msra.mxu0 %v870_v25  ;;  %121 = vmatpush.msra.mxu1 %v120_v49  ;;  %v1419_v39 = vand.u32 4294901760, %v972_v2  ;;  %v1009_v41 = vsub.f32 %v19_v54, %v968_v0  ;;  %v1421_v42 = vand.u32 4294901760, %v983_v8  ;;  %v1015_v43 = vsub.f32 %v48_v60, %v985_v12  ;;  %v44_v60 = vld [vmem:[%s1416_s1 + $0xd8] sm:$0xff] }
  0x13   :  { %219 = vmatpush.msra.mxu2 %v879_v29  ;;  %268 = vmatpush.msra.mxu3 %v870_v25  ;;  %v150_v48 = vand.u32 4294901760, %v149_v21  ;;  %v161_v49 = vsub.f32 %v954_v59, %v1420_v30  ;;  %v1025_v54 = vsub.f32 %v18_v62, %v991_v26  ;;  %v1027_v55 = vand.u32 4294901760, %v46_v36  ;;  %v43_v21 = vld [vmem:[%s1416_s1 + $0xd0] sm:$0xff] }
  0x14   :  { %74 = vmatpush.msra.mxu0 %v892_v33  ;;  %127 = vmatpush.msra.mxu1 %v126_v56  ;;  %v1032_v56 = vsub.f32 %v17_v6, %v996_v31  ;;  %v1035_v57 = vsub.f32 %v47_v7, %v998_v32  ;;  %v167_v62 = vsub.f32 %v972_v2, %v1419_v39  ;;  %v1427_v63 = vand.u32 4294901760, %v1009_v41 }
  0x15   :  { %222 = vmatpush.msra.mxu2 %v907_v40  ;;  %270 = vmatpush.msra.mxu3 %v892_v33  ;;  %1443 = vst [vmem:[#allocation6_spill] sm:$0xff] %v1027_v55  ;;  %v173_v6 = vsub.f32 %v983_v8, %v1421_v42  ;;  %v1429_v7 = vand.u32 4294901760, %v1015_v43  ;;  %v1059_v39 = vsub.f32 %v46_v36, %v1027_v55  ;;  %v1061_v30 = vand.u32 4294901760, %v44_v60 }
  0x16   :  { %76 = vmatpush.msra.mxu0 %v895_v34  ;;  %133 = vmatpush.msra.mxu1 %v132_v61  ;;  %v156_v61 = vand.u32 4294901760, %v155_v38  ;;  %v1430_v38 = vand.u32 4294901760, %v1025_v54  ;;  %v1435_v42 = vand.u32 4294901760, %v1032_v56  ;;  %v1433_v1 = vand.u32 4294901760, %v1035_v57 }
  0x17   :  { %225 = vmatpush.msra.mxu2 %v921_v46  ;;  %272 = vmatpush.msra.mxu3 %v895_v34  ;;  %v179_v36 = vsub.f32 %v1009_v41, %v1427_v63  ;;  %v1077_v51 = vand.u32 4294901760, %v43_v21  ;;  %v174_v35 = vand.u32 4294901760, %v173_v6  ;;  %v1093_v63 = vsub.f32 %v44_v60, %v1061_v30  ;;  %v40_v6 = vld [vmem:[%s1416_s1 + $0xb8] sm:$0xff] }
  0x18   :  { %78 = vmatpush.msra.mxu0 %v917_v44  ;;  %139 = vmatpush.msra.mxu1 %v138_v13  ;;  %v1045_v13 = vand.u32 4294901760, %v45_v47  ;;  %v1118_v23 = vand.u32 4294901760, %v40_v6 }
  0x19   :  { %228 = vmatpush.msra.mxu2 %v936_v52  ;;  %274 = vmatpush.msra.mxu3 %v917_v44  ;;  %v180_v60 = vand.u32 4294901760, %v179_v36  ;;  %v1113_v24 = vsub.f32 %v43_v21, %v1077_v51  ;;  %v1438_v14 = vand.u32 4294901760, %v1093_v63 }
  0x1a   :  { %80 = vmatpush.msra.mxu0 %v932_v50  ;;  %145 = vmatpush.msra.mxu1 %v144_v37  ;;  %v162_v37 = vand.u32 4294901760, %v161_v49  ;;  %v168_v49 = vand.u32 4294901760, %v167_v62  ;;  %v1075_v58 = vsub.f32 %v45_v47, %v1045_v13  ;;  %v185_v47 = vsub.f32 %v1025_v54, %v1430_v38 }
  0x1b   :  { %231 = vmatpush.msra.mxu2 %v954_v59  ;;  %276 = vmatpush.msra.mxu3 %v932_v50  ;;  %v1436_v62 = vand.u32 4294901760, %v1059_v39  ;;  %v191_v38 = vsub.f32 %v1032_v56, %v1435_v42 }
  0x1c   :  { %82 = vmatpush.msra.mxu0 %v940_v53  ;;  %151 = vmatpush.msra.mxu1 %v150_v48  ;;  %v42_v48 = vld [vmem:[%s1416_s1 + $0xc8] sm:$0xff]  ;;  %v1437_v27 = vand.u32 4294901760, %v1075_v58  ;;  %v186_v36 = vand.u32 4294901760, %v185_v47 }
  0x1d   :  { %234 = vmatpush.msra.mxu2 %v972_v2  ;;  %278 = vmatpush.msra.mxu3 %v940_v53  ;;  %v1095_v28 = vand.u32 4294901760, %v42_v48  ;;  %v454_v21 = vsub.f32 %v1059_v39, %v1436_v62  ;;  %v38_v47 = vld [vmem:[%s1416_s1 + $0xa8] sm:$0xff]  ;;  %v192_v62 = vand.u32 4294901760, %v191_v38 }
  0x1e   :  { %84 = vmatpush.msra.mxu0 %v968_v0  ;;  %157 = vmatpush.msra.mxu1 %v156_v61  ;;  %v442_v61 = vsub.f32 %v1015_v43, %v1429_v7  ;;  %v1105_v7 = vand.u32 4294901760, %v41_v45 }
  0x1f   :  { %237 = vmatpush.msra.mxu2 %v983_v8  ;;  %280 = vmatpush.msra.mxu3 %v968_v0  ;;  %v455_v38 = vand.u32 4294901760, %v454_v21 }
  0x20   :  { %86 = vmatpush.msra.mxu0 %v991_v26  ;;  %163 = vmatpush.msra.mxu1 %v162_v37  ;;  %v448_v37 = vsub.f32 %v1035_v57, %v1433_v1  ;;  %v443_v1 = vand.u32 4294901760, %v442_v61  ;;  %v1444_v61 = vand.u32 4294901760, %v845_v15 }
  0x21   :  { %240 = vmatpush.msra.mxu2 %v1009_v41  ;;  %282 = vmatpush.msra.mxu3 %v991_v26 }
  0x22   :  { %88 = vmatpush.msra.mxu0 %v996_v31  ;;  %169 = vmatpush.msra.mxu1 %v168_v49  ;;  %v39_v49 = vld [vmem:[%s1416_s1 + $0xb0] sm:$0xff]  ;;  %v449_v42 = vand.u32 4294901760, %v448_v37  ;;  %v1445_v37 = vand.u32 4294901760, %v849_v16  ;;  %v1160_v16 = vand.u32 4294901760, %v38_v47 }
  0x23   :  { %243 = vmatpush.msra.mxu2 %v1025_v54  ;;  %284 = vmatpush.msra.mxu3 %v996_v31 }
  0x24   :  { %295 = vmatpush.msrb.mxu0 %v100_v22  ;;  %175 = vmatpush.msra.mxu1 %v174_v35  ;;  %v1129_v22 = vsub.f32 %v42_v48, %v1095_v28  ;;  %v1135_v35 = vsub.f32 %v41_v45, %v1105_v7  ;;  %v460_v48 = vsub.f32 %v1075_v58, %v1437_v27 }
  0x25   :  { %246 = vmatpush.msra.mxu2 %v1032_v56  ;;  %444 = vmatpush.msrb.mxu3 %v443_v1  ;;  %v1150_v45 = vsub.f32 %v40_v6, %v1118_v23  ;;  %v466_v27 = vsub.f32 %v1093_v63, %v1438_v14  ;;  %v1446_v1 = vand.u32 4294901760, %v854_v18 }
  0x26   :  { %299 = vmatpush.msrb.mxu0 %v1444_v61  ;;  %181 = vmatpush.msra.mxu1 %v180_v60  ;;  %v1145_v61 = vand.u32 4294901760, %v39_v49  ;;  %v37_v60 = vld [vmem:[%s1416_s1 + $0xa0] sm:$0xff]  ;;  %v461_v21 = vand.u32 4294901760, %v460_v48  ;;  %v1449_v6 = vand.u32 4294901760, %v1129_v22 }
  0x27   :  { %399 = vmatpush.msrb.mxu2 %v985_v12  ;;  %450 = vmatpush.msrb.mxu3 %v449_v42  ;;  %v1175_v18 = vand.u32 4294901760, %v37_v60  ;;  %v1448_v42 = vand.u32 4294901760, %v857_v19  ;;  %v467_v48 = vand.u32 4294901760, %v466_v27  ;;  %v1450_v19 = vand.u32 4294901760, %v860_v20  ;;  %v35_v27 = vld [vmem:[%s1416_s1 + $0x90] sm:$0xff] }
  0x28   :  { %303 = vmatpush.msrb.mxu0 %v1445_v37  ;;  %187 = vmatpush.msra.mxu1 %v186_v36  ;;  %v36_v36 = vld [vmem:[%s1416_s1 + $0x98] sm:$0xff]  ;;  %v1447_v37 = vand.u32 4294901760, %v1113_v24  ;;  %v1173_v15 = vsub.f32 %v39_v49, %v1145_v61  ;;  %v1186_v49 = vsub.f32 %v38_v47, %v1160_v16 }
  0x29   :  { %401 = vmatpush.msrb.mxu2 %v998_v32  ;;  %456 = vmatpush.msrb.mxu3 %v455_v38 }
  0x2a   :  { %307 = vmatpush.msrb.mxu0 %v1446_v1  ;;  %193 = vmatpush.msra.mxu1 %v192_v62  ;;  %v472_v14 = vsub.f32 %v1113_v24, %v1447_v37  ;;  %v1441_v1 = vand.u32 4294901760, %v1150_v45  ;;  %v53_v62 = vld.sshfl [vmem:[#allocation1] sm:$0xff pattern:$0x75316420]  ;;  %v478_v37 = vsub.f32 %v1129_v22, %v1449_v6  ;;  %v1442_v38 = vand.u32 4294901760, %v1173_v15 }
  0x2b   :  { %403 = vmatpush.msrb.mxu2 %v1027_v55  ;;  %v1188_v55 = vand.u32 4294901760, %v36_v36  ;;  %462 = vmatpush.msrb.mxu3 %v461_v21  ;;  %v1202_v6 = vsub.f32 %v37_v60, %v1175_v18  ;;  %v1204_v20 = vand.u32 4294901760, %v53_v62  ;;  %v501_v21 = vand.u32 4294901760, %v1186_v49 }
  0x2c   :  { %311 = vmatpush.msrb.mxu0 %v1448_v42  ;;  %362 = vmatpush.msrb.mxu1 %v813_v3  ;;  %v1451_v3 = vand.u32 4294901760, %v1135_v35  ;;  %v473_v47 = vand.u32 4294901760, %v472_v14  ;;  %v34_v14 = vld [vmem:[%s1416_s1 + $0x88] sm:$0xff]  ;;  %v479_v60 = vand.u32 4294901760, %v478_v37 }
  0x2d   :  { %405 = vmatpush.msrb.mxu2 %v1045_v13  ;;  %468 = vmatpush.msrb.mxu3 %v467_v48  ;;  %v496_v48 = vsub.f32 %v1173_v15, %v1442_v38  ;;  %v1234_v37 = vsub.f32 %v53_v62, %v1204_v20 }
  0x2e   :  { %315 = vmatpush.msrb.mxu0 %v1450_v19  ;;  %364 = vmatpush.msrb.mxu1 %v815_v4  ;;  %v484_v42 = vsub.f32 %v1135_v35, %v1451_v3  ;;  %v1452_v4 = vand.u32 4294901760, %v879_v29  ;;  %v490_v19 = vsub.f32 %v1150_v45, %v1441_v1  ;;  %v1217_v3 = vand.u32 4294901760, %v35_v27  ;;  %v33_v1 = vld [vmem:[%s1416_s1 + $0x80] sm:$0xff] }
  0x2f   :  { %407 = vmatpush.msrb.mxu2 %v1061_v30  ;;  %v1220_v29 = vsub.f32 %v36_v36, %v1188_v55  ;;  %474 = vmatpush.msrb.mxu3 %v473_v47  ;;  %v507_v36 = vand.u32 4294901760, %v1202_v6  ;;  %v502_v47 = vsub.f32 %v1186_v49, %v501_v21  ;;  %v1249_v38 = vand.u32 4294901760, %v33_v1 }
  0x30   :  { %319 = vmatpush.msrb.mxu0 %v1452_v4  ;;  %366 = vmatpush.msrb.mxu1 %v817_v5  ;;  %v1453_v5 = vand.u32 4294901760, %v907_v40  ;;  %v485_v4 = vand.u32 4294901760, %v484_v42  ;;  %v1236_v40 = vand.u32 4294901760, %v34_v14  ;;  %v491_v42 = vand.u32 4294901760, %v490_v19 }
  0x31   :  { %409 = vmatpush.msrb.mxu2 %v1077_v51  ;;  %480 = vmatpush.msrb.mxu3 %v479_v60  ;;  %v1247_v62 = vsub.f32 %v35_v27, %v1217_v3  ;;  %v508_v19 = vsub.f32 %v1202_v6, %v507_v36  ;;  %v91_v60 = vand.u32 4294901760, %v1234_v37 }
  0x32   :  { %323 = vmatpush.msrb.mxu0 %v1453_v5  ;;  %368 = vmatpush.msrb.mxu1 %v828_v9  ;;  %v1454_v9 = vand.u32 4294901760, %v921_v46  ;;  %v513_v5 = vand.u32 4294901760, %v1220_v29  ;;  %v1455_v46 = vand.u32 4294901760, %v936_v52  ;;  %v1260_v27 = vsub.f32 %v34_v14, %v1236_v40 }
  0x33   :  { %411 = vmatpush.msrb.mxu2 %v1095_v28  ;;  %486 = vmatpush.msrb.mxu3 %v485_v4  ;;  %v519_v4 = vand.u32 4294901760, %v1247_v62  ;;  %v1457_v14 = vand.u32 4294901760, %v972_v2 }
  0x34   :  { %327 = vmatpush.msrb.mxu0 %v1454_v9  ;;  %370 = vmatpush.msrb.mxu1 %v830_v10  ;;  %v497_v10 = vand.u32 4294901760, %v496_v48  ;;  %v1456_v9 = vand.u32 4294901760, %v954_v59  ;;  %v514_v52 = vsub.f32 %v1220_v29, %v513_v5  ;;  %v1271_v48 = vsub.f32 %v33_v1, %v1249_v38  ;;  %v54_v59 = vld.sshfl [vmem:[#allocation1 + $0x8] sm:$0xff pattern:$0x75316420] }
  0x35   :  { %413 = vmatpush.msrb.mxu2 %v1105_v7  ;;  %492 = vmatpush.msrb.mxu3 %v491_v42  ;;  %v92_v42 = vsub.f32 %v1234_v37, %v91_v60 }
  0x36   :  { %331 = vmatpush.msrb.mxu0 %v1455_v46  ;;  %372 = vmatpush.msrb.mxu1 %v832_v11  ;;  %v503_v11 = vand.u32 4294901760, %v502_v47  ;;  %v525_v47 = vand.u32 4294901760, %v1260_v27  ;;  %v1458_v46 = vand.u32 4294901760, %v983_v8  ;;  %v515_v2 = vand.u32 4294901760, %v514_v52 }
  0x37   :  { %415 = vmatpush.msrb.mxu2 %v1118_v23  ;;  %498 = vmatpush.msrb.mxu3 %v497_v10  ;;  %v531_v1 = vand.u32 4294901760, %v1271_v48  ;;  %v1287_v10 = vand.u32 4294901760, %v54_v59  ;;  %v1461_v52 = vand.u32 4294901760, %v1032_v56  ;;  %v1465_v56 = vand.u32 4294901760, %v1075_v58 }
  0x38   :  { %335 = vmatpush.msrb.mxu0 %v1456_v9  ;;  %374 = vmatpush.msrb.mxu1 %v851_v17  ;;  %v509_v17 = vand.u32 4294901760, %v508_v19  ;;  %v1459_v19 = vand.u32 4294901760, %v1009_v41  ;;  %v526_v8 = vsub.f32 %v1260_v27, %v525_v47  ;;  %v1460_v9 = vand.u32 4294901760, %v1025_v54 }
  0x39   :  { %417 = vmatpush.msrb.mxu2 %v1145_v61  ;;  %504 = vmatpush.msrb.mxu3 %v503_v11  ;;  %v1304_v11 = vsub.f32 %v54_v59, %v1287_v10 }
  0x3a   :  { %339 = vmatpush.msrb.mxu0 %v1457_v14  ;;  %376 = vmatpush.msrb.mxu1 %v870_v25  ;;  %v520_v25 = vsub.f32 %v1247_v62, %v519_v4 }
  0x3b   :  { %419 = vmatpush.msrb.mxu2 %v1160_v16  ;;  %510 = vmatpush.msrb.mxu3 %v509_v17  ;;  %v432_v14 = vand.u32 4294901760, %v1304_v11 }
  0x3c   :  { %343 = vmatpush.msrb.mxu0 %v1458_v46  ;;  %378 = vmatpush.msrb.mxu1 %v892_v33  ;;  %v93_v33 = vand.u32 4294901760, %v92_v42  ;;  %v521_v41 = vand.u32 4294901760, %v520_v25 }
  0x3d   :  { %421 = vmatpush.msrb.mxu2 %v1175_v18  ;;  %516 = vmatpush.msrb.mxu3 %v515_v2 }
  0x3e   :  { %347 = vmatpush.msrb.mxu0 %v1459_v19  ;;  %380 = vmatpush.msrb.mxu1 %v895_v34  ;;  %v532_v34 = vsub.f32 %v1271_v48, %v531_v1 }
  0x3f   :  { %423 = vmatpush.msrb.mxu2 %v1188_v55  ;;  %94 = vmatmul.f32.vlgmr.msra.gmra.mxu0 %v93_v33 }
  0x40   :  { %351 = vmatpush.msrb.mxu0 %v1460_v9  ;;  %382 = vmatpush.msrb.mxu1 %v917_v44  ;;  %v527_v44 = vand.u32 4294901760, %v526_v8  ;;  %v533_v54 = vand.u32 4294901760, %v532_v34 }
  0x41   :  { %425 = vmatpush.msrb.mxu2 %v1217_v3  ;;  %522 = vmatpush.msrb.mxu3 %v521_v41 }
  0x42   :  { %355 = vmatpush.msrb.mxu0 %v1461_v52  ;;  %384 = vmatpush.msrb.mxu1 %v932_v50  ;;  %v1462_v50 = vand.u32 4294901760, %v1015_v43 }
  0x43   :  { %427 = vmatpush.msrb.mxu2 %v1236_v40  ;;  %528 = vmatpush.msrb.mxu3 %v527_v44 }
  0x44   :  { %542 = vmatpush.msra.mxu0 %v1015_v43  ;;  %386 = vmatpush.msrb.mxu1 %v940_v53  ;;  %v433_v53 = vsub.f32 %v1304_v11, %v432_v14 }
  0x45   :  { %429 = vmatpush.msrb.mxu2 %v1249_v38  ;;  %534 = vmatpush.msrb.mxu3 %v533_v54 }
  0x46   :  { %545 = vmatpush.msra.mxu0 %v1035_v57  ;;  %388 = vmatpush.msrb.mxu1 %v968_v0  ;;  %v1463_v0 = vand.u32 4294901760, %v1035_v57  ;;  %v434_v43 = vand.u32 4294901760, %v433_v53 }
  0x47   :  { %249 = vmatmul.f32.vlgmr.msra.gmra.mxu2 %v1234_v37  ;;  %288 = vmatmul.f32.vlgmr.msra.gmra.mxu3 %v91_v60 }
  0x48   :  { %548 = vmatpush.msra.mxu0 %v1059_v39  ;;  %636 = vmatpush.msra.mxu2 %v1462_v50 }
  0x49   :  { %390 = vmatpush.msrb.mxu1 %v991_v26  ;;  %703 = vmatpush.msra.mxu3 %v985_v12  ;;  %v1464_v26 = vand.u32 4294901760, %v1059_v39  ;;  %v1467_v39 = vand.u32 4294901760, %v1093_v63 }
  0x4a   :  { %551 = vmatpush.msra.mxu0 %v1075_v58  ;;  %640 = vmatpush.msra.mxu2 %v1463_v0  ;;  %v1468_v58 = vand.u32 4294901760, %v1113_v24 }
  0x4b   :  { %392 = vmatpush.msrb.mxu1 %v996_v31  ;;  %705 = vmatpush.msra.mxu3 %v998_v32  ;;  %v1466_v31 = vld [vmem:[#allocation6_spill] sm:$0xff] }
  0x4c   :  { %554 = vmatpush.msra.mxu0 %v1093_v63  ;;  %195 = vmatmul.f32.vlgmr.msra.gmra.mxu1 %v1204_v20 }
  0x4d   :  { %644 = vmatpush.msra.mxu2 %v1464_v26  ;;  %595 = vmatpush.msra.mxu1 %v985_v12  ;;  %v1469_v12 = vand.u32 4294901760, %v1129_v22 }
  0x4e   :  { %557 = vmatpush.msra.mxu0 %v1113_v24  ;;  %707 = vmatpush.msra.mxu3 %v1466_v31  ;;  %v1470_v24 = vand.u32 4294901760, %v1135_v35 }
  0x4f   :  { %648 = vmatpush.msra.mxu2 %v1465_v56  ;;  %597 = vmatpush.msra.mxu1 %v998_v32 }
  0x50   :  { %435 = vmatmul.f32.vlgmr.msrb.gmra.mxu2 %v434_v43  ;;  %560 = vmatpush.msra.mxu0 %v1129_v22 }
  0x51   :  { %599 = vmatpush.msra.mxu1 %v1466_v31  ;;  %652 = vmatpush.msra.mxu2 %v1467_v39 }
  0x52   :  { %709 = vmatpush.msra.mxu3 %v1045_v13  ;;  %357 = vmatmul.f32.vlgmr.msrb.gmra.mxu0 %v1204_v20 }
  0x53   :  { %536 = vmatmul.f32.vlgmr.msrb.gmra.mxu3 %v1287_v10  ;;  %563 = vmatpush.msra.mxu0 %v1135_v35 }
  0x54   :  { %601 = vmatpush.msra.mxu1 %v1045_v13  ;;  %656 = vmatpush.msra.mxu2 %v1468_v58 }
  0x55   :  { %711 = vmatpush.msra.mxu3 %v1061_v30  ;;  %394 = vmatmul.f32.vlgmr.msrb.gmra.mxu1 %v1204_v20 }
  0x56   :  { %566 = vmatpush.msra.mxu0 %v1150_v45  ;;  %603 = vmatpush.msra.mxu1 %v1061_v30  ;;  %v1471_v30 = vand.u32 4294901760, %v1150_v45 }
  0x57   :  { %660 = vmatpush.msra.mxu2 %v1469_v12  ;;  %713 = vmatpush.msra.mxu3 %v1077_v51 }
  0x58   :  { %569 = vmatpush.msra.mxu0 %v1173_v15  ;;  %605 = vmatpush.msra.mxu1 %v1077_v51  ;;  %v1472_v51 = vand.u32 4294901760, %v1173_v15 }
  0x59   :  { %664 = vmatpush.msra.mxu2 %v1470_v24  ;;  %715 = vmatpush.msra.mxu3 %v1095_v28 }
  0x5a   :  { %572 = vmatpush.msra.mxu0 %v1186_v49  ;;  %607 = vmatpush.msra.mxu1 %v1095_v28 }
  0x5b   :  { %668 = vmatpush.msra.mxu2 %v1471_v30  ;;  %717 = vmatpush.msra.mxu3 %v1105_v7 }
  0x5c   :  { %575 = vmatpush.msra.mxu0 %v1202_v6  ;;  %609 = vmatpush.msra.mxu1 %v1105_v7 }
  0x5d   :  { %672 = vmatpush.msra.mxu2 %v1472_v51  ;;  %719 = vmatpush.msra.mxu3 %v1118_v23 }
  0x5e   :  { %578 = vmatpush.msra.mxu0 %v1220_v29  ;;  %611 = vmatpush.msra.mxu1 %v1118_v23  ;;  %v50_v23 = vstv %s1415_s0  ;;  %s783_s0 = smov [#allocation3]  }
  0x5f   :  { %676 = vmatpush.msra.mxu2 %v501_v21  ;;  %721 = vmatpush.msra.mxu3 %v1145_v61  ;;  %s745_s23 = sshll.u32 %s783_s0, 4  ;;  %s746_s23 = int_to_ptr.vmem [resolvable:$true] %s745_s23 }
  0x60   :  { %581 = vmatpush.msra.mxu0 %v1247_v62  ;;  %613 = vmatpush.msra.mxu1 %v1145_v61 }
  0x61   :  { %680 = vmatpush.msra.mxu2 %v507_v36  ;;  %723 = vmatpush.msra.mxu3 %v1160_v16 }
  0x62   :  { %584 = vmatpush.msra.mxu0 %v1260_v27  ;;  %615 = vmatpush.msra.mxu1 %v1160_v16 }
  0x63   :  { %684 = vmatpush.msra.mxu2 %v513_v5  ;;  %725 = vmatpush.msra.mxu3 %v1175_v18 }
  0x64   :  { %587 = vmatpush.msra.mxu0 %v1271_v48  ;;  %617 = vmatpush.msra.mxu1 %v1175_v18 }
  0x65   :  { %688 = vmatpush.msra.mxu2 %v519_v4  ;;  %727 = vmatpush.msra.mxu3 %v1188_v55 }
  0x66   :  { %590 = vmatmul.f32.vlgmr.msra.gmra.mxu0 %v1304_v11  ;;  %619 = vmatpush.msra.mxu1 %v1188_v55 }
  0x67   :  { %692 = vmatpush.msra.mxu2 %v525_v47  ;;  %729 = vmatpush.msra.mxu3 %v1217_v3 }
  0x68   :  { %621 = vmatpush.msra.mxu1 %v1217_v3 }
  0x69   :  { %696 = vmatpush.msra.mxu2 %v531_v1  ;;  %731 = vmatpush.msra.mxu3 %v1236_v40 }
  0x6a   :  { %698 = vmatmul.f32.vlgmr.msra.gmra.mxu2 %v1287_v10  ;;  %623 = vmatpush.msra.mxu1 %v1236_v40 }
  0x6b   :  { %733 = vmatpush.msra.mxu3 %v1249_v38 }
  0x6c   :  { %735 = vmatmul.f32.vlgmr.msra.gmra.mxu3 %v1287_v10  ;;  %625 = vmatpush.msra.mxu1 %v1249_v38 }
  0x6d   :  { %629 = vmatmul.f32.vlgmr.msra.gmra.mxu1 %v432_v14 }
  0xbc   :  { %v95_v28 = vpop.f32.mrf.mxu0 }
  0xbd   :  { %v96_v32 = vadd.f32 %v95_v28, %v50_v23 }
  0xc9   :  { %v196_v55 = vpop.f32.mrf.mxu1 }
  0xca   :  { %v197_v57 = vadd.f32 %v196_v55, %v96_v32  ;;  %v250_v63 = vpop.f32.mrf.mxu2  ;;  %v289_v7 = vpop.f32.mrf.mxu3 }
  0xcc   :  { %v251_v13 = vadd.f32 %v250_v63, %v197_v57 }
  0xce   :  { %v290_v22 = vadd.f32 %v289_v7, %v251_v13 }
  0xcf   :  { %v358_v35 = vpop.f32.mrf.mxu0 }
  0xd0   :  { %v359_v15 = vadd.f32 %v358_v35, %v290_v22 }
  0xd2   :  { %v395_v61 = vpop.f32.mrf.mxu1 }
  0xd3   :  { %v396_v45 = vadd.f32 %v395_v61, %v359_v15  ;;  %v436_v16 = vpop.f32.mrf.mxu2 }
  0xd5   :  { %v437_v18 = vadd.f32 %v436_v16, %v396_v45 }
  0xd6   :  { %v537_v49 = vpop.f32.mrf.mxu3 }
  0xd7   :  { %v538_v6 = vadd.f32 %v537_v49, %v437_v18 }
  0xe3   :  { %v591_v38 = vpop.f32.mrf.mxu0 }
  0xe4   :  { %v592_v20 = vadd.f32 %v591_v38, %v538_v6 }
  0xea   :  { %v630_v21 = vpop.f32.mrf.mxu1 }
  0xeb   :  { %v631_v3 = vadd.f32 %v630_v21, %v592_v20 }
  0xed   :  { %v699_v29 = vpop.f32.mrf.mxu2 }
  0xee   :  { %v700_v36 = vadd.f32 %v699_v29, %v631_v3 }
  0xef   :  { %v736_v37 = vpop.f32.mrf.mxu3 }
  0xf0   :  { %v737_v40 = vadd.f32 %v736_v37, %v700_v36 }
  0xf2   :  { %739 = vst [vmem:[#allocation3] sm:$0xf] %v737_v40 }
  0xf3   :  { %750 = dma.vmem_to_hbm [thread:$0]  %s746_s23, 64, %s748_s26, [#allocation4]  }
  0xf4   :  { %781 = dma.done.wait [#allocation4], 64  }
  0xf5   :  { %782 = vsyncadd [#allocation4], 4294967232 }
  0xf6   :  { %755 = vsyncpa [#allocation4], 1 }

</bundles_post_ra>
